<compile_context>
chip_gen: v6e
topology: v6e:2x2x1
jax: 0.10.0
libtpu: 0.0.40
codegen_flags: <defaults>
</compile_context>

<pallas_src>
import functools

import jax
import jax.numpy as jnp
from jax import lax
from jax.experimental import pallas as pl
from jax.experimental.pallas import tpu as pltpu


_SQRT_2_OVER_PI = 0.7978845608028654
_INV_SQRT2 = 0.7071067811865476


def _gelu_tanh(x):
    # tanh-approximate GELU: cubic on the VPU, tanh on the EUP (its own slot).
    return 0.5 * x * (1.0 + jnp.tanh(_SQRT_2_OVER_PI * (x + 0.044715 * (x * x * x))))


def _gelu_erf(x):
    # exact (torch default) GELU — heavier VALU polynomial, kept as an option.
    return 0.5 * x * (1.0 + lax.erf(x * _INV_SQRT2))


def distance_head_kernel(x_ref, wd_ref, bd_ref, gwc_ref, scal_ref, o_ref, *,
                         approximate_gelu, eps):
    # x_ref block: (1, tS, S, H) ; o_ref block: (1, tS, S)
    _, tS, S, H = x_ref.shape
    rows = tS * S

    x2d = x_ref[0].reshape(rows, H)                               # (rows, H)

    # Transposed-orientation dense layer on the MXU (NT dot, like q @ k^T):
    #   h[h_out, r] = sum_hin Wd[h_out, h_in] * x[r, h_in]   ->  (H, rows)
    h = lax.dot_general(
        wd_ref[...], x2d,
        dimension_numbers=(((1,), (1,)), ((), ())),
        preferred_element_type=jnp.float32)
    h = h + bd_ref[...]                                           # (H,1) bcast over lanes

    h = _gelu_tanh(h) if approximate_gelu else _gelu_erf(h)

    # Fused LayerNorm(H) + out_proj(H->1), one-pass moments.
    # Reductions run along the sublane axis (axis 0): mostly plain VALU adds.
    inv_h = 1.0 / H
    s1 = jnp.sum(h, axis=0, keepdims=True)                        # (1, rows)
    s2 = jnp.sum(h * h, axis=0, keepdims=True)                    # (1, rows)
    proj = jnp.sum(h * gwc_ref[...], axis=0, keepdims=True)       # (1, rows)

    mean = s1 * inv_h
    var = s2 * inv_h - mean * mean
    y = lax.rsqrt(var + eps) * proj + scal_ref[0]                 # (1, rows)

    o_ref[0] = y.reshape(tS, S).astype(o_ref.dtype)


def _round_up(x, m):
    return (x + m - 1) // m * m


def _pick_tile_s(S, H, itemsize, target_bytes):
    """Rows-per-tile: multiple of 8, x-tile <= target_bytes, never > round_up(S,8)."""
    rows = target_bytes // max(1, S * H * itemsize)
    rows = max(8, (rows // 8) * 8)
    return int(min(rows, _round_up(S, 8)))


def distance_head(x, dense_w, dense_b, ln_g, ln_b, out_w, out_b, *,
                  tile_s=None, approximate_gelu=True, eps=1e-5):
    """Pallas DistanceHead forward.

    x:        (B, S, S, H) float32
    dense_w:  (H, H)  PyTorch layout (out, in)      dense_b: (H,)
    ln_g:     (H,)    LayerNorm gamma               ln_b:    (H,)
    out_w:    (1, H)  PyTorch layout (out, in)      out_b:   (1,)
    """
    B, S, S2, H = x.shape
    assert S == S2
    f32 = jnp.float32

    # --- parameter folding (wrapper-side, tiny) -----------------------------
    wd = dense_w.astype(x.dtype)                                  # (H, H) out x in
    bd = dense_b.reshape(H, 1).astype(f32)                        # (H, 1)
    gw = (ln_g.reshape(-1).astype(f32) * out_w.reshape(-1).astype(f32))
    gwc = (gw - jnp.sum(gw) / H).reshape(H, 1)                    # centered gamma*wo
    bw = jnp.sum(ln_b.reshape(-1).astype(f32) * out_w.reshape(-1).astype(f32)) \
        + out_b.reshape(()).astype(f32)
    scal = bw.reshape(1)                                          # SMEM scalar

    # --- generation-aware tiling / VMEM budget -------------------------------
    try:
        vmem_cap = int(pltpu.get_tpu_info().vmem_capacity_bytes)
    except Exception:  # pragma: no cover - off-TPU / old runtime fallback
        vmem_cap = 64 << 20
    if tile_s is None:
        # ~2 MiB x-tiles on v7x (64 MiB VMEM), ~4 MiB on v5e/v6e (128 MiB).
        target_bytes = max(1 << 20, min(8 << 20, vmem_cap >> 5))
        tile_s = _pick_tile_s(S, H, x.dtype.itemsize, target_bytes)
    assert tile_s >= 8 and tile_s % 8 == 0, "tile_s must be a multiple of 8"

    n_tiles = pl.cdiv(S, tile_s)   # tail tile handled by Pallas masked blocks
    grid = (B, n_tiles)            # both parallel -> v7x megacore sharding

    x_tile_bytes = tile_s * S * H * x.dtype.itemsize
    o_tile_bytes = tile_s * S * 4
    h_bytes = tile_s * S * H * 4
    param_bytes = (H * H + 2 * H) * 4
    vmem_bytes = 2 * x_tile_bytes + 2 * o_tile_bytes + 3 * h_bytes \
        + param_bytes + (2 << 20)
    vmem_bytes = int(min(max(vmem_bytes, 16 << 20),
                         max(16 << 20, int(0.45 * vmem_cap))))

    kernel = functools.partial(distance_head_kernel,
                               approximate_gelu=approximate_gelu, eps=eps)

    y = pl.pallas_call(
        kernel,
        out_shape=jax.ShapeDtypeStruct((B, S, S), jnp.float32),
        grid_spec=pltpu.PrefetchScalarGridSpec(
            num_scalar_prefetch=0,
            grid=grid,
            in_specs=[
                pl.BlockSpec((1, tile_s, S, H), lambda b, i: (b, i, 0, 0)),
                pl.BlockSpec((H, H), lambda b, i: (0, 0)),
                pl.BlockSpec((H, 1), lambda b, i: (0, 0)),
                pl.BlockSpec((H, 1), lambda b, i: (0, 0)),
                pl.BlockSpec(memory_space=pltpu.MemorySpace.SMEM),
            ],
            out_specs=pl.BlockSpec((1, tile_s, S), lambda b, i: (b, i, 0)),
        ),
        compiler_params=pltpu.CompilerParams(
            dimension_semantics=("parallel", "parallel"),
            vmem_limit_bytes=vmem_bytes),
    )(x, wd, bd, gwc, scal)

    # Symmetrize outside the kernel (cheap XLA op on (B, S, S)).
    return (y + jnp.swapaxes(y, -1, -2)) * 0.5


def reference(x, dense_w, dense_b, ln_g, ln_b, out_w, out_b, *,
              approximate_gelu=True, eps=1e-5):
    """Pure-JAX reference mirroring the PyTorch forward (unfused)."""
    h = jnp.einsum("bijh,kh->bijk", x, dense_w, precision="highest") + dense_b
    h = _gelu_tanh(h) if approximate_gelu else _gelu_erf(h)
    mean = jnp.mean(h, axis=-1, keepdims=True)
    var = jnp.mean((h - mean) ** 2, axis=-1, keepdims=True)
    hn = (h - mean) * lax.rsqrt(var + eps) * ln_g + ln_b
    y = jnp.einsum("bijh,oh->bijo", hn, out_w, precision="highest")[..., 0] + out_b[0]
    return (y + jnp.swapaxes(y, -1, -2)) * 0.5


if __name__ == "__main__":
    B, S, H = 2, 16, 32  # bsz, seq_len, heads (small test shapes)

    key = jax.random.PRNGKey(0)
    kx, kwd, kbd, kg, kb, kwo, kbo = jax.random.split(key, 7)

    x = jax.random.normal(kx, (B, S, S, H), dtype=jnp.float32)

    # Synthetic params in native PyTorch layouts.
    dense_w = 0.1 * jax.random.normal(kwd, (H, H), dtype=jnp.float32)   # (out, in)
    dense_b = 0.1 * jax.random.normal(kbd, (H,), dtype=jnp.float32)
    ln_g = 1.0 + 0.1 * jax.random.normal(kg, (H,), dtype=jnp.float32)
    ln_b = 0.1 * jax.random.normal(kb, (H,), dtype=jnp.float32)
    out_w = 0.1 * jax.random.normal(kwo, (1, H), dtype=jnp.float32)     # (out, in)
    out_b = 0.1 * jax.random.normal(kbo, (1,), dtype=jnp.float32)

    ref = reference(x, dense_w, dense_b, ln_g, ln_b, out_w, out_b)

    # tile_s=8 exercises the multi-step row-tiled grid at small S.
    out = distance_head(x, dense_w, dense_b, ln_g, ln_b, out_w, out_b, tile_s=8)
    out = jax.block_until_ready(out)
    assert out.shape == (B, S, S)
    err = float(jnp.max(jnp.abs(out - ref)))
    # Tolerance covers MXU f32 internal rounding differences vs XLA's einsum;
    # the LayerNorm/out_proj fusion algebra itself is exact.
    assert jnp.allclose(out, ref, atol=5e-3, rtol=5e-3), f"mismatch, max abs err={err}"

    # Auto tile selection path (single tile per batch element at this size).
    out2 = jax.block_until_ready(
        distance_head(x, dense_w, dense_b, ln_g, ln_b, out_w, out_b))
    err2 = float(jnp.max(jnp.abs(out2 - ref)))
    assert jnp.allclose(out2, ref, atol=5e-3, rtol=5e-3), f"mismatch (auto), max abs err={err2}"

    print("KERNEL_OK")
</pallas_src>

<mosaic_0001>
module attributes {stable_mosaic.version = 11 : i64} {
  func.func @distance_head_kernel(%arg0: i32, %arg1: i32, %arg2: memref<1x8x16x32xf32, #tpu.memory_space<vmem>>, %arg3: memref<32x32xf32, #tpu.memory_space<vmem>>, %arg4: memref<32x1xf32, #tpu.memory_space<vmem>>, %arg5: memref<32x1xf32, #tpu.memory_space<vmem>>, %arg6: memref<1xf32, #tpu.memory_space<smem>>, %arg7: memref<1x8x16xf32, #tpu.memory_space<vmem>>) attributes {dimension_semantics = [#tpu.dimension_semantics<parallel>, #tpu.dimension_semantics<parallel>], iteration_bounds = array<i64: 2, 2>, scalar_prefetch = 0 : i64, scratch_operands = 0 : i64, tpu.core_type = #tpu.core_type<tc>, window_params = [{transform_indices = @transform_0, window_bounds = array<i64: 1, 8, 16, 32>}, {pipeline_mode = #tpu.pipeline_mode<synchronous>, transform_indices = @transform_1, window_bounds = array<i64: 32, 32>}, {pipeline_mode = #tpu.pipeline_mode<synchronous>, transform_indices = @transform_2, window_bounds = array<i64: 32, 1>}, {pipeline_mode = #tpu.pipeline_mode<synchronous>, transform_indices = @transform_3, window_bounds = array<i64: 32, 1>}, {transform_indices = @transform_4, window_bounds = array<i64: 1>}, {transform_indices = @transform_5, window_bounds = array<i64: 1, 8, 16>}]} {
    %c0 = arith.constant 0 : index
    %c0_0 = arith.constant 0 : index
    %c0_1 = arith.constant 0 : index
    %c0_2 = arith.constant 0 : index
    %0 = vector.load %arg2[%c0, %c0_0, %c0_1, %c0_2] : memref<1x8x16x32xf32, #tpu.memory_space<vmem>>, vector<1x8x16x32xf32>
    %1 = vector.shape_cast %0 : vector<1x8x16x32xf32> to vector<8x16x32xf32>
    %2 = vector.shape_cast %1 : vector<8x16x32xf32> to vector<128x32xf32>
    %c0_3 = arith.constant 0 : index
    %c0_4 = arith.constant 0 : index
    %3 = vector.load %arg3[%c0_3, %c0_4] : memref<32x32xf32, #tpu.memory_space<vmem>>, vector<32x32xf32>
    %cst = arith.constant dense<0.000000e+00> : vector<32x128xf32>
    %4 = tpu.matmul %3, %2, %cst {dimension_numbers = #tpu.dot_dimension_numbers<[1], [1], [0], [0], [0, 0, 1, 0], [], []>} : vector<32x32xf32>, vector<128x32xf32>, vector<32x128xf32> -> vector<32x128xf32>
    %c0_5 = arith.constant 0 : index
    %c0_6 = arith.constant 0 : index
    %5 = vector.load %arg4[%c0_5, %c0_6] : memref<32x1xf32, #tpu.memory_space<vmem>>, vector<32x1xf32>
    %6 = vector.broadcast %5 : vector<32x1xf32> to vector<32x128xf32>
    %7 = arith.addf %4, %6 : vector<32x128xf32>
    %cst_7 = arith.constant 5.000000e-01 : f32
    %8 = vector.broadcast %cst_7 : f32 to vector<32x128xf32>
    %9 = arith.mulf %8, %7 : vector<32x128xf32>
    %10 = arith.mulf %7, %7 : vector<32x128xf32>
    %11 = arith.mulf %10, %7 : vector<32x128xf32>
    %cst_8 = arith.constant 4.471500e-02 : f32
    %12 = vector.broadcast %cst_8 : f32 to vector<32x128xf32>
    %13 = arith.mulf %12, %11 : vector<32x128xf32>
    %14 = arith.addf %7, %13 : vector<32x128xf32>
    %cst_9 = arith.constant 0.797884583 : f32
    %15 = vector.broadcast %cst_9 : f32 to vector<32x128xf32>
    %16 = arith.mulf %15, %14 : vector<32x128xf32>
    %17 = math.tanh %16 : vector<32x128xf32>
    %cst_10 = arith.constant 1.000000e+00 : f32
    %18 = vector.broadcast %cst_10 : f32 to vector<32x128xf32>
    %19 = arith.addf %18, %17 : vector<32x128xf32>
    %20 = arith.mulf %9, %19 : vector<32x128xf32>
    %cst_11 = arith.constant dense<0.000000e+00> : vector<128xf32>
    %21 = vector.multi_reduction <add>, %20, %cst_11 [0] : vector<32x128xf32> to vector<128xf32>
    %22 = vector.shape_cast %21 : vector<128xf32> to vector<1x128xf32>
    %23 = arith.mulf %20, %20 : vector<32x128xf32>
    %cst_12 = arith.constant dense<0.000000e+00> : vector<128xf32>
    %24 = vector.multi_reduction <add>, %23, %cst_12 [0] : vector<32x128xf32> to vector<128xf32>
    %25 = vector.shape_cast %24 : vector<128xf32> to vector<1x128xf32>
    %c0_13 = arith.constant 0 : index
    %c0_14 = arith.constant 0 : index
    %26 = vector.load %arg5[%c0_13, %c0_14] : memref<32x1xf32, #tpu.memory_space<vmem>>, vector<32x1xf32>
    %27 = vector.broadcast %26 : vector<32x1xf32> to vector<32x128xf32>
    %28 = arith.mulf %20, %27 : vector<32x128xf32>
    %cst_15 = arith.constant dense<0.000000e+00> : vector<128xf32>
    %29 = vector.multi_reduction <add>, %28, %cst_15 [0] : vector<32x128xf32> to vector<128xf32>
    %30 = vector.shape_cast %29 : vector<128xf32> to vector<1x128xf32>
    %cst_16 = arith.constant 3.125000e-02 : f32
    %31 = vector.broadcast %cst_16 : f32 to vector<1x128xf32>
    %32 = arith.mulf %22, %31 : vector<1x128xf32>
    %cst_17 = arith.constant 3.125000e-02 : f32
    %33 = vector.broadcast %cst_17 : f32 to vector<1x128xf32>
    %34 = arith.mulf %25, %33 : vector<1x128xf32>
    %35 = arith.mulf %32, %32 : vector<1x128xf32>
    %36 = arith.subf %34, %35 : vector<1x128xf32>
    %cst_18 = arith.constant 9.99999974E-6 : f32
    %37 = vector.broadcast %cst_18 : f32 to vector<1x128xf32>
    %38 = arith.addf %36, %37 : vector<1x128xf32>
    %39 = math.rsqrt %38 : vector<1x128xf32>
    %40 = arith.mulf %39, %30 : vector<1x128xf32>
    %c0_19 = arith.constant 0 : index
    %41 = memref.load %arg6[%c0_19] : memref<1xf32, #tpu.memory_space<smem>>
    %42 = vector.broadcast %41 : f32 to vector<1x128xf32>
    %43 = arith.addf %40, %42 : vector<1x128xf32>
    %44 = vector.shape_cast %43 : vector<1x128xf32> to vector<8x16xf32>
    %c0_20 = arith.constant 0 : index
    %c0_21 = arith.constant 0 : index
    %c0_22 = arith.constant 0 : index
    %45 = vector.load %arg7[%c0_20, %c0_21, %c0_22] : memref<1x8x16xf32, #tpu.memory_space<vmem>>, vector<1x8x16xf32>
    %46 = vector.shape_cast %45 : vector<1x8x16xf32> to vector<8x16xf32>
    %47 = vector.shape_cast %44 : vector<8x16xf32> to vector<1x8x16xf32>
    tpu.vector_store %arg7[%c0_20, %c0_21, %c0_22], %47 {strides = array<i32>} : memref<1x8x16xf32, #tpu.memory_space<vmem>>, vector<1x8x16xf32>,
    return
  }
  func.func @transform_0(%arg0: i32, %arg1: i32) -> (i32, i32, i32, i32) {
    %c0_i32 = arith.constant 0 : i32
    %c0_i32_0 = arith.constant 0 : i32
    %c0_i32_1 = arith.constant 0 : i32
    return %arg0, %arg1, %c0_i32, %c0_i32_0 : i32, i32, i32, i32
  }
  func.func @transform_1(%arg0: i32, %arg1: i32) -> (i32, i32) {
    %c0_i32 = arith.constant 0 : i32
    %c0_i32_0 = arith.constant 0 : i32
    %c0_i32_1 = arith.constant 0 : i32
    return %c0_i32, %c0_i32_0 : i32, i32
  }
  func.func @transform_2(%arg0: i32, %arg1: i32) -> (i32, i32) {
    %c0_i32 = arith.constant 0 : i32
    %c0_i32_0 = arith.constant 0 : i32
    %c0_i32_1 = arith.constant 0 : i32
    return %c0_i32, %c0_i32_0 : i32, i32
  }
  func.func @transform_3(%arg0: i32, %arg1: i32) -> (i32, i32) {
    %c0_i32 = arith.constant 0 : i32
    %c0_i32_0 = arith.constant 0 : i32
    %c0_i32_1 = arith.constant 0 : i32
    return %c0_i32, %c0_i32_0 : i32, i32
  }
  func.func @transform_4(%arg0: i32, %arg1: i32) -> i32 {
    %c0_i32 = arith.constant 0 : i32
    %c0_i32_0 = arith.constant 0 : i32
    return %c0_i32 : i32
  }
  func.func @transform_5(%arg0: i32, %arg1: i32) -> (i32, i32, i32) {
    %c0_i32 = arith.constant 0 : i32
    %c0_i32_0 = arith.constant 0 : i32
    return %arg0, %arg1, %c0_i32 : i32, i32, i32
  }
}

</mosaic_0001>

<bundles_post_ra>
// kernel: tpu_custom_call.1
= control target key start
LH: loop header
LB: loop body
LE: loop exit
PB: predicated region body
PF: predicated region fallthrough
CT: control target
= control target key end

     0   :  { %s1412_s0 = inlined_call_operand.hbm [shape: f32[2,16,16,32], index: 0, kind: input, shape index: {}]   ;;  %s1413_s1 = inlined_call_operand.vmem [shape: f32[32,32], index: 1, kind: input, shape index: {}]   ;;  %s1414_s2 = inlined_call_operand.vmem [shape: f32[32,1], index: 2, kind: input, shape index: {}]   ;;  %s1415_s3 = inlined_call_operand.vmem [shape: f32[32,1], index: 3, kind: input, shape index: {}]   ;;  %s1416_s4 = inlined_call_operand.<no memory space> [shape: f32[1], index: 4, kind: input, shape index: {}]   ;;  %s1417_s5 = inlined_call_operand.hbm [shape: f32[2,16,16], index: 5, kind: output, shape index: {}]  }
   0x1   :  { %10 = sst [smem:[#allocation2]] %s1416_s4 }
   0x2   :  { %11 = vsyncpa [#allocation4], 0 }
   0x3   :  { %13 = vsyncpa [#allocation4 + $0x1], 0 }
   0x4   :  { %14 = vsyncpa [#allocation5], 0 }
   0x5   :  { %16 = vsyncpa [#allocation5 + $0x1], 0  ;;  %s1137_s20 = smov 0   ;;  %s1139_s21 = smov 0  }
   0x6   :  { %s1141_s22 = smov 0   ;;  %s1143_s23 = smov 0  }
   0x7   :  { %s1145_s24 = smov 0   ;;  %s1147_s25 = smov 0  }
   0x8   :  { %s1149_s26 = smov 0   ;;  %s1151_s27 = smov 0  }
   0x9 LB: > { %1421 = sst [smem:[#allocation9_spill]] %s1080_s25  ;;  %s734_s4 = sadd.s32 4294967295, %s1088_s27   ;;  %s1088_s27 = sphi %s1151_s27, %s22_s27   ;;  %s1084_s26 = sphi %s1149_s26, %s1436_s26   ;;  %s1080_s25 = sphi %s1147_s25, %s1430_s25   ;;  %s1076_s24 = sphi %s1145_s24, %s1435_s24   ;;  %s1072_s23 = sphi %s1143_s23, %s1429_s23   ;;  %s1068_s22 = sphi %s1141_s22, %s1434_s22   ;;  %s1064_s21 = sphi %s1139_s21, %s1433_s21   ;;  %s1060_s20 = sphi %s1137_s20, %s1432_s20  }
   0xa   : > { %s735_s28 = sadd.s32 4294967294, %s1088_s27   ;;  %s31_s29 = sadd.s32 1, %s1080_s25 }
   0xb   : > { %s34_s30 = sadd.s32 1, %s1084_s26  ;;  %p32_p0 = scmp.ge.s32.totalorder %s31_s29, 2 }
   0xc   : > { %s43_s6 = sadd.s32 1, %s1068_s22  ;;  %p50_p1 = scmp.ne.s32.totalorder %s1068_s22, %s1064_s21 }
   0xd   : > { %p51_p2 = scmp.eq.s32.totalorder %s1088_s27, 0  ;;  %s1438_s29 = smov (%p32_p0, %s31_s29), 0 }
   0xe   : > { %1422 = sst [smem:[#allocation10_spill]] %s1438_s29  ;;  %s1440_s30 = smov (!%p32_p0, %s34_s30), %s1084_s26 }
   0xf   : > { %s39_s7 = ssub.s32 %s1080_s25, %s1438_s29  ;;  %p1190_p3 = por %p51_p2, %p50_p1 }
  0x10   : > { %p36_p4 = scmp.ge.s32.totalorder %s1440_s30, 2  ;;  %p56_p5 = scmp.ne.s32.totalorder %s1064_s21, %s1060_s20 }
  0x11   : > { %p57_p6 = scmp.eq.s32.totalorder %s734_s4, 0  ;;  %p166_p7 = scmp.eq.s32.totalorder %s734_s4, 3 }
  0x12   : > { %s1442_s30 = smov (%p36_p4, %s1440_s30), 0  ;;  %p172_p10 = scmp.eq.s32.totalorder %s735_s28, 3 }
  0x13   : > { %1424 = sst [smem:[#allocation11_spill]] %s1442_s30  ;;  %p1198_p8 = por %p57_p6, %p56_p5 }
  0x14   : > { %p1202_p9 = por %p166_p7, %p50_p1  ;;  %s38_s11 = ssub.s32 %s1084_s26, %s1442_s30 }
  0x15   : > { %s40_s12 = sor.u32 %s39_s7, %s38_s11  ;;  %p1208_p12 = por %p172_p10, %p56_p5 }
  0x16   : > { %p41_p11 = scmp.eq.s32.totalorder %s40_s12, 0  ;;  %p874_p13 = scmp.lt.s32.totalorder %s1088_s27, 4 }
  0x17   : > { %s204_s14 = sand.u32 1, %s1068_s22   ;;  %s771_s17 = sshll.u32 %s1080_s25, 4 }
  0x18   : > { %s1215_s15 = scalar_select %p41_p11, %s1068_s22, %s43_s6  }
  0x19   : > { %s738_s16 = sshll.u32 %s204_s14, 7  ;;  %s741_s18 = sshll.u32 %s1084_s26, 5 }
  0x1a   : > { %s208_s19 = scalar_lea.vmem [#allocation3], %s738_s16  ;;  %s215_s29 = sadd.s32 %s771_s17, %s741_s18 }
  0x1b   : > { %s218_s4 = sshll.u32 %s208_s19, 4  ;;  %s742_s30 = sshll.u32 %s215_s29, 7  ;;  %s219_s4 = int_to_ptr.vmem [resolvable:$true] %s218_s4 }
  0x1c   : > { %p1221_p0 = pnand %p874_p13, %p1190_p3  ;;  %s217_s12 = scalar_lea.hbm %s1412_s0, %s742_s30 }
  0x1d   : > { %s205_s6 = scalar_lea.sflag [#allocation4], %s204_s14  ;;  %s977_s25 = scalar_lea.vmem %s219_s4, 2048 }
  0x1e   : > { %p966_p1 = pneg %p1221_p0  ;;  %p978_p2 = scmp.ne.s32.totalorder %s219_s4, %s977_s25 }
  0x1f   : > { %s1090_s16 = smov [#allocation3]  }
  0x20   : > { %p980_p4 = pnand %p978_p2, %p966_p1  ;;  %s982_s17 = sshll.u32 %s1090_s16, 4  ;;  %s983_s17 = int_to_ptr.vmem [resolvable:$false] %s982_s17 }
  0x21   : > { %s984_s29 = scalar_lea.vmem %s983_s17, 4096  ;;  %p985_p3 = scmp.lt.s32.totalorder %s219_s4, %s983_s17 }
  0x22   : > { %p981_p5 = pneg %p980_p4  ;;  %p986_p6 = scmp.lt.s32.totalorder %s984_s29, %s977_s25 }
  0x24   : > { %p987_p7 = por %p986_p6, %p985_p3 }
  0x26   : > { %p988_p10 = pnand %p987_p7, %p981_p5 }
  0x28   : > { %991 = shalt.err (!%p988_p10)
}
  0x29   : > { %s1091_s8 = smov 128   ;;  %s1092_s30 = smov 8  }
  0x2a   : > { %869 = dma.hbm_to_vmem [thread:$0]  (!%p1221_p0), %s217_s12, 2048, %s219_s4, %s205_s6, %s1091_s8, %s1091_s8, %s1092_s30  }
  0x2b   : > { %p743_p11 = scmp.ge.s32.totalorder %s1088_s27, 1  ;;  %p226_p13 = scmp.lt.s32.totalorder %s1088_s27, 5 }
  0x2d   : > { %p227_p1 = pnand %p743_p11, %p226_p13 }
  0x2e   : > { %s1235_s14 = sand.u32 (!%p227_p1), 1, %s1064_s21  }
  0x2f   : > { %230 = sbr.rel (%p227_p1) target bundleno = 538 (0x21a), region = 40  ;;  %s744_s25 = sshll.u32 (!%p227_p1), %s1235_s14, 7 }
  0x30   : > { %s233_s18 = scalar_lea.sflag (!%p227_p1), [#allocation4], %s1235_s14  ;;  %s1239_s19 = scalar_lea.vmem (!%p227_p1), [#allocation3], %s744_s25 }
  0x34   : > { %1051 = dma.done.wait (%p1198_p8), %s233_s18, 2048  }
  0x35   : > { %1053 = vsyncadd (%p1198_p8), %s233_s18, 4294965248  ;;  %v1093_v0 = vmov 0   ;;  %vm308_vm0 = vcmask 261120   ;;  %v279_v1 = vld [vmem:[%s1239_s19 + $0x78] sm:$0xff]  ;;  %v278_v2 = vld [vmem:[%s1239_s19 + $0x70] sm:$0xff]  ;;  %s1094_s8 = smov 96  }
  0x36   : > { %952 = vset.pattern.permute.xlu0 %v1093_v0  ;;  %953 = vset.pattern.permute.xlu1 %v1093_v0  ;;  %v277_v3 = vld [vmem:[%s1239_s19 + $0x68] sm:$0xff]  ;;  %v280_v4 = vld [vmem:[%s1413_s1] sm:$0xff]  ;;  %v282_v5 = vld [vmem:[%s1413_s1 + $0x10] sm:$0xff]  ;;  %s1095_s30 = smov 112   ;;  %s1096_s25 = smov 64   ;;  %vm630_vm1 = vcmask 130048  }
  0x37   : > { %792 = vmatprep.subr.msk.mxu0 %vm308_vm0, %v279_v1  ;;  %830 = vmatprep.subr.msk.mxu1 %vm308_vm0, %v279_v1  ;;  %v284_v6 = vld [vmem:[%s1414_s2] sm:$0xff]  ;;  %v286_v7 = vld [vmem:[%s1414_s2 + $0x10] sm:$0xff]  ;;  %v285_v9 = vld [vmem:[%s1414_s2 + $0x8] sm:$0xff]  ;;  %s1097_s18 = smov 80   ;;  %s1098_s9 = smov 32  }
  0x38   : > { %793 = vmatpush3.xpose.msk.msra.mxu0 %vm308_vm0, %v279_v1  ;;  %846 = vmatpush3.xpose.msk.msra.mxu1 %vm308_vm0, %v279_v1  ;;  %v276_v8 = vld [vmem:[%s1239_s19 + $0x60] sm:$0xff]  ;;  %v287_v10 = vld [vmem:[%s1414_s2 + $0x18] sm:$0xff]  ;;  %v513_v13 = vld [vmem:[%s1415_s3 + $0x8] sm:$0xff]  ;;  %s1099_s4 = smov 48   ;;  %s1100_s28 = smov 16  }
  0x39   : > { %794 = vmatprep.subr.msk.mxu0 %vm308_vm0, %v278_v2  ;;  %831 = vmatprep.subr.msk.mxu1 %vm308_vm0, %v278_v2  ;;  %v275_v11 = vld [vmem:[%s1239_s19 + $0x58] sm:$0xff]  ;;  %v512_v12 = vld [vmem:[%s1415_s3] sm:$0xff]  ;;  %v274_v14 = vld [vmem:[%s1239_s19 + $0x50] sm:$0xff]  ;;  %s745_s7 = sshll.u32 %s1235_s14, 3  ;;  %s767_s11 = sshll.u32 %s1076_s24, 1 }
  0x3a   : > { %824 = vmatprep.mubr.msk.f32.mxu0 %vm308_vm0, %v280_v4  ;;  %827 = vmatprep.mubr.msk.f32.mxu1 %vm308_vm0, %v282_v5  ;;  %v514_v15 = vld [vmem:[%s1415_s3 + $0x10] sm:$0xff]  ;;  %v515_v16 = vld [vmem:[%s1415_s3 + $0x18] sm:$0xff]  ;;  %v273_v17 = vld [vmem:[%s1239_s19 + $0x48] sm:$0xff]  ;;  %s644_s12 = sadd.s32 %s1072_s23, %s767_s11  ;;  %s262_s16 = scalar_lea.vmem [#allocation6], %s745_s7 }
  0x3b   : > { %290 = vperm.xlu0 %952, %v284_v6   ;;  %300 = vperm.xlu1 %953, %v286_v7   ;;  %v272_v18 = vld [vmem:[%s1239_s19 + $0x40] sm:$0xff]  ;;  %v271_v19 = vld [vmem:[%s1239_s19 + $0x38] sm:$0xff]  ;;  %v270_v20 = vld [vmem:[%s1239_s19 + $0x30] sm:$0xff]  ;;  %s768_s6 = sshll.u32 %s644_s12, 7  ;;  %s648_s17 = sshll.u32 %s262_s16, 4  ;;  %s649_s17 = int_to_ptr.vmem [resolvable:$true] %s648_s17 }
  0x3c   : > { %795 = vmatpush3.xpose.msk.msra.mxu0 %vm308_vm0, %v278_v2  ;;  %847 = vmatpush3.xpose.msk.msra.mxu1 %vm308_vm0, %v278_v2  ;;  %v269_v21 = vld [vmem:[%s1239_s19 + $0x28] sm:$0xff]  ;;  %v268_v22 = vld [vmem:[%s1239_s19 + $0x20] sm:$0xff]  ;;  %v267_v23 = vld [vmem:[%s1239_s19 + $0x18] sm:$0xff]  ;;  %s646_s24 = scalar_lea.hbm %s1417_s5, %s768_s6  ;;  %s1103_s23 = smov [#allocation6]  }
  0x3d   : > { %796 = vmatprep.subr.msk.mxu0 %vm308_vm0, %v277_v3  ;;  %832 = vmatprep.subr.msk.mxu1 %vm308_vm0, %v277_v3  ;;  %v266_v24 = vld [vmem:[%s1239_s19 + $0x10] sm:$0xff]  ;;  %v265_v25 = vld [vmem:[%s1239_s19 + $0x8] sm:$0xff]  ;;  %v264_v26 = vld [vmem:[%s1239_s19] sm:$0xff]  ;;  %s556_s19 = sld [smem:[#allocation2]] }
  0x3e   : > { %v281_v27 = vld [vmem:[%s1413_s1 + $0x8] sm:$0xff]  ;;  %v283_v28 = vld [vmem:[%s1413_s1 + $0x18] sm:$0xff] }
  0x3f   : > { %295 = vperm.xlu0 %952, %v285_v9   ;;  %305 = vperm.xlu1 %953, %v287_v10  }
  0x40   : > { %797 = vmatpush3.xpose.msk.msra.mxu0 %vm308_vm0, %v277_v3  ;;  %848 = vmatpush3.xpose.msk.msra.mxu1 %vm308_vm0, %v277_v3 }
  0x41   : > { %798 = vmatprep.subr.msk.mxu0 %vm308_vm0, %v276_v8  ;;  %833 = vmatprep.subr.msk.mxu1 %vm308_vm0, %v276_v8 }
  0x43   : > { %518 = vperm.xlu0 %952, %v512_v12   ;;  %523 = vperm.xlu1 %953, %v513_v13  }
  0x44   : > { %799 = vmatpush3.xpose.msk.msra.mxu0 %vm308_vm0, %v276_v8  ;;  %849 = vmatpush3.xpose.msk.msra.mxu1 %vm308_vm0, %v276_v8 }
  0x45   : > { %800 = vmatprep.subr.msk.mxu0 %vm308_vm0, %v275_v11  ;;  %834 = vmatprep.subr.msk.mxu1 %vm308_vm0, %v275_v11 }
  0x47   : > { %528 = vperm.xlu0 %952, %v514_v15   ;;  %533 = vperm.xlu1 %953, %v515_v16  }
  0x48   : > { %801 = vmatpush3.xpose.msk.msra.mxu0 %vm308_vm0, %v275_v11  ;;  %850 = vmatpush3.xpose.msk.msra.mxu1 %vm308_vm0, %v275_v11 }
  0x49   : > { %802 = vmatprep.subr.msk.mxu0 %vm308_vm0, %v274_v14  ;;  %835 = vmatprep.subr.msk.mxu1 %vm308_vm0, %v274_v14 }
  0x4c   : > { %803 = vmatpush3.xpose.msk.msra.mxu0 %vm308_vm0, %v274_v14  ;;  %851 = vmatpush3.xpose.msk.msra.mxu1 %vm308_vm0, %v274_v14 }
  0x4d   : > { %804 = vmatprep.subr.msk.mxu0 %vm308_vm0, %v273_v17  ;;  %836 = vmatprep.subr.msk.mxu1 %vm308_vm0, %v273_v17 }
  0x50   : > { %805 = vmatpush3.xpose.msk.msra.mxu0 %vm308_vm0, %v273_v17  ;;  %852 = vmatpush3.xpose.msk.msra.mxu1 %vm308_vm0, %v273_v17 }
  0x51   : > { %806 = vmatprep.subr.msk.mxu0 %vm308_vm0, %v272_v18  ;;  %837 = vmatprep.subr.msk.mxu1 %vm308_vm0, %v272_v18 }
  0x54   : > { %807 = vmatpush3.xpose.msk.msra.mxu0 %vm308_vm0, %v272_v18  ;;  %853 = vmatpush3.xpose.msk.msra.mxu1 %vm308_vm0, %v272_v18 }
  0x55   : > { %808 = vmatprep.subr.msk.mxu0 %vm308_vm0, %v271_v19  ;;  %838 = vmatprep.subr.msk.mxu1 %vm308_vm0, %v271_v19 }
  0x58   : > { %809 = vmatpush3.xpose.msk.msra.mxu0 %vm308_vm0, %v271_v19  ;;  %854 = vmatpush3.xpose.msk.msra.mxu1 %vm308_vm0, %v271_v19 }
  0x59   : > { %810 = vmatprep.subr.msk.mxu0 %vm308_vm0, %v270_v20  ;;  %839 = vmatprep.subr.msk.mxu1 %vm308_vm0, %v270_v20 }
  0x5c   : > { %811 = vmatpush3.xpose.msk.msra.mxu0 %vm308_vm0, %v270_v20  ;;  %855 = vmatpush3.xpose.msk.msra.mxu1 %vm308_vm0, %v270_v20 }
  0x5d   : > { %812 = vmatprep.subr.msk.mxu0 %vm308_vm0, %v269_v21  ;;  %840 = vmatprep.subr.msk.mxu1 %vm308_vm0, %v269_v21 }
  0x60   : > { %813 = vmatpush3.xpose.msk.msra.mxu0 %vm308_vm0, %v269_v21  ;;  %856 = vmatpush3.xpose.msk.msra.mxu1 %vm308_vm0, %v269_v21 }
  0x61   : > { %814 = vmatprep.subr.msk.mxu0 %vm308_vm0, %v268_v22  ;;  %841 = vmatprep.subr.msk.mxu1 %vm308_vm0, %v268_v22 }
  0x64   : > { %815 = vmatpush3.xpose.msk.msra.mxu0 %vm308_vm0, %v268_v22  ;;  %857 = vmatpush3.xpose.msk.msra.mxu1 %vm308_vm0, %v268_v22 }
  0x65   : > { %816 = vmatprep.subr.msk.mxu0 %vm308_vm0, %v267_v23  ;;  %842 = vmatprep.subr.msk.mxu1 %vm308_vm0, %v267_v23 }
  0x68   : > { %817 = vmatpush3.xpose.msk.msra.mxu0 %vm308_vm0, %v267_v23  ;;  %858 = vmatpush3.xpose.msk.msra.mxu1 %vm308_vm0, %v267_v23 }
  0x69   : > { %818 = vmatprep.subr.msk.mxu0 %vm308_vm0, %v266_v24  ;;  %843 = vmatprep.subr.msk.mxu1 %vm308_vm0, %v266_v24 }
  0x6c   : > { %819 = vmatpush3.xpose.msk.msra.mxu0 %vm308_vm0, %v266_v24  ;;  %859 = vmatpush3.xpose.msk.msra.mxu1 %vm308_vm0, %v266_v24 }
  0x6d   : > { %820 = vmatprep.subr.msk.mxu0 %vm308_vm0, %v265_v25  ;;  %844 = vmatprep.subr.msk.mxu1 %vm308_vm0, %v265_v25 }
  0x70   : > { %821 = vmatpush3.xpose.msk.msra.mxu0 %vm308_vm0, %v265_v25  ;;  %860 = vmatpush3.xpose.msk.msra.mxu1 %vm308_vm0, %v265_v25 }
  0x71   : > { %822 = vmatprep.subr.msk.mxu0 %vm308_vm0, %v264_v26  ;;  %845 = vmatprep.subr.msk.mxu1 %vm308_vm0, %v264_v26 }
  0x74   : > { %823 = vmatpush3.xpose.msk.msra.mxu0 %vm308_vm0, %v264_v26  ;;  %861 = vmatpush3.xpose.msk.msra.mxu1 %vm308_vm0, %v264_v26 }
  0x77   : > { %825 = vmatmul.mubr.msk.f32.vlgmr.msra.gmra.mxu0 %vm308_vm0, %v281_v27  ;;  %828 = vmatmul.mubr.msk.f32.vlgmr.msra.gmra.mxu1 %vm308_vm0, %v283_v28 }
  0xb6   : > { %v291_v29 = vpop.permute.xlu0 %290  ;;  %v301_v30 = vpop.permute.xlu1 %300 }
  0xba   : > { %v296_v31 = vpop.permute.xlu0 %295  ;;  %v306_v32 = vpop.permute.xlu1 %305 }
  0xbe   : > { %v519_v16 = vpop.permute.xlu0 %518  ;;  %v524_v21 = vpop.permute.xlu1 %523 }
 0x137   : > { %v826_v33 = vpop.f32.mrf.mxu0  ;;  %v829_v34 = vpop.f32.mrf.mxu1 }
 0x138   : > { %v441_v35 = vadd.f32 %v826_v33, %v296_v31  ;;  %v451_v36 = vadd.f32 %v829_v34, %v306_v32 }
 0x139   : > { %v435_v37 = vpop.f32.mrf.mxu0  ;;  %v445_v38 = vpop.f32.mrf.mxu1 }
 0x13a   : > { %v459_v39 = vmul.f32 %v441_v35, %v441_v35  ;;  %v461_v40 = vmul.f32 %v451_v36, %v451_v36  ;;  %v436_v41 = vadd.f32 %v435_v37, %v291_v29  ;;  %v446_v42 = vadd.f32 %v445_v38, %v301_v30  ;;  %v529_v29 = vpop.permute.xlu0 %528 }
 0x13b   : > { %v455_v0 = vmul.f32 0.5, %v441_v35  ;;  %v457_v9 = vmul.f32 0.5, %v451_v36 }
 0x13c   : > { %v463_v43 = vmul.f32 %v459_v39, %v441_v35  ;;  %v465_v44 = vmul.f32 %v461_v40, %v451_v36  ;;  %v458_v45 = vmul.f32 %v436_v41, %v436_v41  ;;  %v460_v46 = vmul.f32 %v446_v42, %v446_v42 }
 0x13d   : > { %v454_v5 = vmul.f32 0.5, %v436_v41  ;;  %v456_v7 = vmul.f32 0.5, %v446_v42 }
 0x13e   : > { %v467_v47 = vmul.f32 0.044715, %v463_v43  ;;  %v469_v48 = vmul.f32 0.044715, %v465_v44  ;;  %v462_v49 = vmul.f32 %v458_v45, %v436_v41  ;;  %v464_v50 = vmul.f32 %v460_v46, %v446_v42 }
 0x140   : > { %v471_v51 = vadd.f32 %v467_v47, %v441_v35  ;;  %v473_v52 = vadd.f32 %v469_v48, %v451_v36  ;;  %v466_v53 = vmul.f32 0.044715, %v462_v49  ;;  %v468_v54 = vmul.f32 0.044715, %v464_v50  ;;  %v534_v36 = vpop.permute.xlu1 %533 }
 0x142   : > { %v475_v55 = vmul.f32 0.7978846, %v471_v51  ;;  %v477_v56 = vmul.f32 0.7978846, %v473_v52  ;;  %v470_v57 = vadd.f32 %v466_v53, %v436_v41  ;;  %v472_v58 = vadd.f32 %v468_v54, %v446_v42 }
 0x144   : > { %954 = vtanh.f32 %v475_v55  ;;  %v474_v59 = vmul.f32 0.7978846, %v470_v57  ;;  %v476_v60 = vmul.f32 0.7978846, %v472_v58  ;;  %v557_v58 = vstv %s556_s19 }
 0x145   : > { %956 = vtanh.f32 %v477_v56 }
 0x146   : > { %958 = vtanh.f32 %v474_v59 }
 0x147   : > { %960 = vtanh.f32 %v476_v60 }
 0x151   : > { %v955_v61 = vpop.eup %954 }
 0x152   : > { %v957_v62 = vpop.eup %956  ;;  %v483_v63 = vadd.f32 1.0, %v955_v61 }
 0x153   : > { %v959_v1 = vpop.eup %958  ;;  %v485_v4 = vadd.f32 1.0, %v957_v62 }
 0x154   : > { %v961_v2 = vpop.eup %960  ;;  %v487_v3 = vmul.f32 %v483_v63, %v455_v0  ;;  %v482_v6 = vadd.f32 1.0, %v959_v1  ;;  %v1101_v63 = vmov 1983009808   ;;  %v585_v1 = vlaneseq }
 0x155   : > { %v484_v8 = vadd.f32 1.0, %v961_v2  ;;  %v489_v13 = vmul.f32 %v485_v4, %v457_v9  ;;  %v583_v0 = vunpack.c.l.s4 %v1101_v63 }
 0x156   : > { %v486_v10 = vmul.f32 %v482_v6, %v454_v5  ;;  %v500_v12 = vmul.f32 %v487_v3, %v487_v3  ;;  %v537_v22 = vmul.f32 %v524_v21, %v487_v3  ;;  %v586_v5 = vshrl.u32 %v585_v1, 7 }
 0x157   : > { %v488_v11 = vmul.f32 %v484_v8, %v456_v7  ;;  %v502_v23 = vmul.f32 %v489_v13, %v489_v13  ;;  %v539_v37 = vmul.f32 %v534_v36, %v489_v13  ;;  %v584_v4 = vunpack.c.0.s8 %v583_v0 }
 0x158   : > { %v490_v14 = vadd.f32 %v487_v3, %v486_v10  ;;  %v499_v15 = vmul.f32 %v486_v10, %v486_v10  ;;  %v536_v18 = vmul.f32 %v519_v16, %v486_v10  ;;  %v1102_v6 = vmov 1934713408  }
 0x159   : > { %v501_v20 = vmul.f32 %v488_v11, %v488_v11  ;;  %v538_v32 = vmul.f32 %v529_v29, %v488_v11  ;;  %v615_v7 = vunpack.c.l.s4 %v1102_v6 }
 0x15a   : > { %v503_v17 = vadd.f32 %v500_v12, %v499_v15  ;;  %v491_v19 = vadd.f32 %v490_v14, %v488_v11  ;;  %v540_v26 = vadd.f32 %v537_v22, %v536_v18  ;;  %v587_v11 = vsub.s32 %v584_v4, %v586_v5 }
 0x15c   : > { %v492_v24 = vadd.f32 %v491_v19, %v489_v13  ;;  %v504_v25 = vadd.f32 %v503_v17, %v501_v20  ;;  %v541_v35 = vadd.f32 %v540_v26, %v538_v32  ;;  %v616_v13 = vunpack.c.0.s8 %v615_v7 }
 0x15e   : > { %v493_v27 = vrot.slane %v492_v24, 4  ;;  %v505_v28 = vadd.f32 %v504_v25, %v502_v23  ;;  %v542_v42 = vadd.f32 %v541_v35, %v539_v37  ;;  %v619_v19 = vsub.s32 %v616_v13, %v586_v5 }
 0x160   : > { %v494_v30 = vadd.f32 %v493_v27, %v492_v24  ;;  %v506_v31 = vrot.slane %v505_v28, 4  ;;  %v543_v46 = vrot.slane %v542_v42, 4 }
 0x162   : > { %v495_v33 = vrot.slane %v494_v30, 2  ;;  %v507_v34 = vadd.f32 %v506_v31, %v505_v28  ;;  %v544_v50 = vadd.f32 %v543_v46, %v542_v42 }
 0x164   : > { %v496_v38 = vadd.f32 %v495_v33, %v494_v30  ;;  %v508_v39 = vrot.slane %v507_v34, 2  ;;  %v545_v53 = vrot.slane %v544_v50, 2 }
 0x166   : > { %v497_v40 = vrot.slane %v496_v38, 1  ;;  %v509_v41 = vadd.f32 %v508_v39, %v507_v34  ;;  %v546_v54 = vadd.f32 %v545_v53, %v544_v50 }
 0x168   : > { %v498_v43 = vadd.f32 %v497_v40, %v496_v38  ;;  %v510_v44 = vrot.slane %v509_v41, 1  ;;  %v547_v55 = vrot.slane %v546_v54, 1 }
 0x16a   : > { %v511_v45 = vadd.f32 %v510_v44, %v509_v41  ;;  %v549_v47 = vmul.f32 0.03125, %v498_v43  ;;  %v548_v56 = vadd.f32 %v547_v55, %v546_v54 }
 0x16c   : > { %v550_v48 = vmul.f32 0.03125, %v511_v45  ;;  %v551_v49 = vmul.f32 %v549_v47, %v549_v47 }
 0x16e   : > { %v552_v51 = vsub.f32 %v550_v48, %v551_v49 }
 0x170   : > { %v553_v52 = vadd.f32 1e-05, %v552_v51 }
 0x172   : > { %962 = vrsqrt.f32 %v553_v52 }
 0x17f   : > { %v963_v57 = vpop.eup %962 }
 0x180   : > { %v555_v59 = vmul.f32 %v963_v57, %v548_v56 }
 0x182   : > { %v558_v60 = vadd.f32 %v557_v58, %v555_v59 }
 0x184   : > { %563 = vrot.lane.b32.xlu1 %v558_v60, %s1094_s8  ;;  %560 = vrot.lane.b32.xlu0 %v558_v60, %s1095_s30  ;;  %s633_s8 = scalar_lea.sflag [#allocation5], %s1235_s14  ;;  %s992_s30 = scalar_lea.vmem %s649_s17, 128 }
 0x185   : > { %p993_p8 = scmp.ne.s32.totalorder %s649_s17, %s992_s30 }
 0x187   : > { %p994_p0 = pnand %p993_p8, %p1202_p9 }
 0x188   : > { %569 = vrot.lane.b32.xlu1 %v558_v60, %s1096_s25  ;;  %566 = vrot.lane.b32.xlu0 %v558_v60, %s1097_s18  ;;  %s996_s25 = sshll.u32 %s1103_s23, 4  ;;  %s997_s25 = int_to_ptr.vmem [resolvable:$false] %s996_s25 }
 0x189   : > { %p995_p2 = pneg %p994_p0  ;;  %s998_s18 = scalar_lea.vmem %s997_s25, 256 }
 0x18a   : > { %p999_p4 = scmp.lt.s32.totalorder %s649_s17, %s997_s25  ;;  %p1000_p5 = scmp.lt.s32.totalorder %s998_s18, %s992_s30 }
 0x18c   : > { %575 = vrot.lane.b32.xlu1 %v558_v60, %s1098_s9  ;;  %572 = vrot.lane.b32.xlu0 %v558_v60, %s1099_s4  ;;  %p1001_p3 = por %p1000_p5, %p999_p4 }
 0x18e   : > { %p1002_p6 = pnand %p1001_p3, %p995_p2 }
 0x190   : > { %578 = vrot.lane.b32.xlu0 %v558_v60, %s1100_s28 }
 0x1f6   : > { %v564_v61 = vpop.permute.xlu1 %563  ;;  %v561_v62 = vpop.permute.xlu0 %560 }
 0x1f7   : > { %v581_v12 = vcombine.low %v558_v60, %v564_v61 }
 0x1f9   : > { %v588_v17 = vrot.slane %v581_v12, %v587_v11 }
 0x1fa   : > { %v570_v2 = vpop.permute.xlu1 %569  ;;  %v567_v3 = vpop.permute.xlu0 %566 }
 0x1fb   : > { %v589_v8 = vcombine.low %v561_v62, %v567_v3 }
 0x1fd   : > { %v596_v14 = vrot.slane %v589_v8, %v587_v11 }
 0x1fe   : > { %v576_v9 = vpop.permute.xlu1 %575  ;;  %v573_v10 = vpop.permute.xlu0 %572 }
 0x1ff   : > { %v597_v15 = vcombine.low %v570_v2, %v576_v9  ;;  %v613_v20 = vcombine.low %v588_v17, %v596_v14 }
 0x201   : > { %v604_v21 = vrot.slane %v597_v15, %v587_v11  ;;  %v620_v24 = vrot.slane %v613_v20, %v619_v19 }
 0x202   : > { %v579_v16 = vpop.permute.xlu0 %578 }
 0x203   : > { %v605_v18 = vcombine.low %v573_v10, %v579_v16 }
 0x205   : > { %v612_v22 = vrot.slane %v605_v18, %v587_v11 }
 0x207   : > { %v621_v23 = vcombine.low %v604_v21, %v612_v22 }
 0x209   : > { %v628_v25 = vrot.slane %v621_v23, %v619_v19 }
 0x20b   : > { %v629_v26 = vcombine.low %v620_v24, %v628_v25 }
 0x20d   : > { %631 = vst.msk [vmem:[%s262_s16] sm:$0xff] %vm630_vm1, %v629_v26 }
 0x20e   : > { %1005 = shalt.err (!%p1002_p6)
}
 0x20f   : > { %s1006_s9 = scalar_lea.hbm %s646_s24, 128  ;;  %s1010_s28 = scalar_lea.hbm %s1417_s5, 512 }
 0x210   : > { %p1007_p7 = scmp.ne.s32.totalorder %s646_s24, %s1006_s9  ;;  %p1011_p13 = scmp.lt.s32.totalorder %s646_s24, %s1417_s5 }
 0x211   : > { %p1012_p1 = scmp.lt.s32.totalorder %s1010_s28, %s1006_s9 }
 0x212   : > { %p1008_p10 = pnand %p1007_p7, %p1202_p9 }
 0x213   : > { %p1013_p8 = por %p1012_p1, %p1011_p13 }
 0x214   : > { %p1009_p11 = pneg %p1008_p10 }
 0x216   : > { %p1014_p0 = pnand %p1013_p8, %p1009_p11 }
 0x218   : > { %1017 = shalt.err (!%p1014_p0)
}
 0x219   : > { %864 = dma.vmem_to_hbm [thread:$0]  (%p1202_p9), %s649_s17, 128, %s646_s24, %s633_s8  }
 0x21a PF: > { %p875_p2 = scmp.ge.s32.totalorder %s1088_s27, 2  ;;  %s660_s12 = sand.u32 1, %s1060_s20  }
 0x21b   : > { %s661_s6 = scalar_lea.sflag [#allocation5], %s660_s12 }
 0x21c   : > { %p871_p4 = pnand %p875_p2, %p1208_p12 }
 0x21e   : > { %p872_p5 = pneg %p871_p4 }
 0x220   : > { %1055 = dma.done.wait (%p872_p5), %s661_s6, 128  }
 0x221   : > { %1057 = vsyncadd (%p872_p5), %s661_s6, 4294967168  ;;  %s22_s27 = sadd.s32 1, %s1088_s27   ;;  %s1429_s23 = sld [smem:[#allocation9_spill]] }
 0x222   : > { %p19_p3 = scmp.ge.s32.totalorder %s22_s27, 6   ;;  %s1430_s25 = sld [smem:[#allocation10_spill]] }
 0x223   : > { %s1431_s10 = sld [smem:[#allocation11_spill]]  ;;  %s1432_s20 = smov %s1064_s21 }
 0x224   : > { %s1433_s21 = smov %s1068_s22  ;;  %s1434_s22 = smov %s1215_s15 }
 0x225   : > { %s1435_s24 = smov %s1084_s26  ;;  %21 = sbr.rel (!%p19_p3) target bundleno = 9 (0x9), region = 85 }
 0x229   : > { %s1436_s26 = smov %s1431_s10 }
 0x22a   :  { %666 = vsyncpa [#allocation4], 1 }
 0x22b   :  { %668 = vsyncpa [#allocation4 + $0x1], 1 }
 0x22c   :  { %669 = vsyncpa [#allocation5], 1 }
 0x22d   :  { %671 = vsyncpa [#allocation5 + $0x1], 1 }

</bundles_post_ra>
